<compile_context>
chip_gen: v5e
topology: v5e:2x2
jax: 0.10.0
libtpu: 0.0.40
codegen_flags: <defaults>
</compile_context>

<pallas_src>
import jax
import jax.numpy as jnp
from jax import lax
from jax.experimental import pallas as pl
from jax.experimental.pallas import tpu as pltpu

NEG_SLOPE = 0.01            # F.leaky_relu default
NEG_INF = -1e30             # finite "masked" logit (avoids inf-inf NaNs)
LANE = 128
SUBLANE = 8
Z_RESIDENT_BYTES = 8 * 1024 * 1024   # keep z fully VMEM-resident below this


def _round_up(x, m):
    return (x + m - 1) // m * m


def _pick_tile(n, cap, granule, min_steps=1):
    """Largest t dividing n with t <= cap, n // t >= min_steps, and
    (t % granule == 0 or t == n). Falls back to the full axis."""
    best = None
    for t in range(1, min(cap, n) + 1):
        if n % t:
            continue
        if n // t < min_steps:
            continue
        if t % granule and t != n:
            continue
        if best is None or t > best:
            best = t
    return best if best is not None else n


def _stage2_vmem_limit(N, dt, st, out_p, z_resident):
    adj_b = 2 * dt * st                               # int8, double-buffered
    z_b = 2 * (N if z_resident else st) * out_p * 2   # bf16
    out_b = 2 * dt * out_p * 4                        # f32 output block
    vec_b = 2 * (st + dt) * 4                         # s_src / s_dst blocks
    scr_b = 2 * dt * 4                                # m / l scratch
    est = adj_b + z_b + out_b + vec_b + scr_b
    # Generous headroom, floored at the v6e/v7x scoped default, capped well
    # under v7x's 64 MiB physical VMEM (v5e/v6e have 128 MiB physical).
    return int(min(max(est * 3 // 2, 32 * 1024 * 1024), 48 * 1024 * 1024))


# --------------------------------------------------------------------------
# Stage 1: node projection + per-node attention logits
#   z      = h @ W                     (tn, out_p)  bf16 (halves z DMA bytes)
#   s_dst  = sum(z * a_dst, axis=-1)   (tn, 1)      column
#   s_src  = a_src . z[j]              (1, tn)      lane-major row (MXU NT)
# --------------------------------------------------------------------------
def fc_kernel(h_ref, w_ref, a_ref, z_ref, ssrc_ref, sdst_ref):
    # bf16 x bf16 -> f32 on the MXU (operands pre-cast in the wrapper).
    z = jnp.dot(h_ref[...], w_ref[...], preferred_element_type=jnp.float32)
    a = a_ref[...]                                            # (2, out_p) f32
    # dst logit as a column: VPU broadcast-multiply + lane (XLU) reduce.
    sdst_ref[...] = jnp.sum(z * a[1:2, :], axis=-1, keepdims=True)
    # src logit emitted lane-major directly: (1, out_p) x (tn, out_p)^T -> (1, tn).
    # Lane-dense output store; no transpose between the two pallas_calls.
    ssrc_ref[...] = lax.dot_general(a[0:1, :], z, (((1,), (1,)), ((), ())),
                                    preferred_element_type=jnp.float32)
    z_ref[...] = z.astype(z_ref.dtype)


# --------------------------------------------------------------------------
# Stage 2: tiled masked-softmax aggregation (online softmax over src tiles)
# --------------------------------------------------------------------------
def _make_agg_kernel(st, z_resident):
    def agg_kernel(adj_ref, z_ref, ssrc_ref, sdst_ref, out_ref, m_sc, l_sc):
        k = pl.program_id(1)

        @pl.when(k == 0)
        def _():
            m_sc[...] = jnp.full_like(m_sc, NEG_INF)
            l_sc[...] = jnp.zeros_like(l_sc)
            out_ref[...] = jnp.zeros_like(out_ref)

        mask = adj_ref[...] != 0                          # int8 block, reused twice
        # e[i, j] = leaky_relu(a_dst.z[i] + a_src.z[j])
        e = sdst_ref[...] + ssrc_ref[...]                 # (dt,1)+(1,st)->(dt,st)
        e = jnp.maximum(e, NEG_SLOPE * e)                 # leaky_relu (1 VPU op saved)
        e = jnp.where(mask, e, NEG_INF)

        m_prev = m_sc[...]
        m_new = jnp.maximum(m_prev, jnp.max(e, axis=1, keepdims=True))
        corr = jnp.exp(m_prev - m_new)
        # Keep this mask: rows whose src tiles so far are fully masked have
        # e == m_new == NEG_INF, so exp(e - m_new) would be 1 without it.
        p = jnp.where(mask, jnp.exp(e - m_new), 0.0)      # (dt, st) f32

        l_sc[...] = corr * l_sc[...] + jnp.sum(p, axis=1, keepdims=True)

        if z_resident:
            z_blk = z_ref[pl.ds(pl.multiple_of(k * st, st), st), :]
        else:
            z_blk = z_ref[...]
        # Un-normalized aggregation directly into the k-resident output block
        # (bf16 MXU operands, f32 accumulation).
        out_ref[...] = corr * out_ref[...] + jnp.dot(
            p.astype(jnp.bfloat16), z_blk, preferred_element_type=jnp.float32)
        m_sc[...] = m_new

        @pl.when(k == pl.num_programs(1) - 1)
        def _():
            # Normalize once after aggregation; zero in-degree rows return 0
            # (DGL would NaN -- documented deviation).
            denom = jnp.maximum(l_sc[...], 1e-20)
            out_ref[...] = out_ref[...] * pl.reciprocal(denom, approx=True)

    return agg_kernel


# --------------------------------------------------------------------------
# Wrapper
# --------------------------------------------------------------------------
def gat_layer(h, w_fc, attn, adj):
    """
    h    : (N, in_dim)       node features
    w_fc : (in_dim, out_dim) f32  (torch fc.weight transposed)
    attn : (2, out_dim)      f32: row 0 = src half, row 1 = dst half of attn_fc.weight
    adj  : (N, N)            adj[i, j] != 0 iff edge j(src) -> i(dst);
                             pass int8/bool to avoid an extra full N^2 cast.
    returns (N, out_dim) f32
    """
    N, in_dim = h.shape
    out_dim = w_fc.shape[1]
    out_p = _round_up(out_dim, LANE)          # lane-dense z / output width

    # Pre-cast matmul operands to bf16 in the wrapper; zero-pad feature axis
    # (exact: padded columns contribute 0 everywhere).
    h_bf = h.astype(jnp.bfloat16)
    w_p = jnp.zeros((in_dim, out_p), jnp.bfloat16).at[:, :out_dim].set(
        w_fc.astype(jnp.bfloat16))
    a_p = jnp.zeros((2, out_p), jnp.float32).at[:, :out_dim].set(
        attn.astype(jnp.float32))
    adj_i8 = adj if adj.dtype == jnp.int8 else adj.astype(jnp.int8)

    # ---- tile selection --------------------------------------------------
    tn = _pick_tile(N, 1024, LANE)                    # stage-1 node tile
    dt = _pick_tile(N, 1024, SUBLANE, min_steps=2)    # dst tile; >=2 steps (v7x 2 TCs)
    st = _pick_tile(N, 2048, LANE)                    # src tile (adj lane dim)

    z_resident = N * out_p * 2 <= Z_RESIDENT_BYTES

    # ---- stage 1: projection + logits -------------------------------------
    z, s_src, s_dst = pl.pallas_call(
        fc_kernel,
        out_shape=(jax.ShapeDtypeStruct((N, out_p), jnp.bfloat16),
                   jax.ShapeDtypeStruct((1, N), jnp.float32),
                   jax.ShapeDtypeStruct((N, 1), jnp.float32)),
        grid=(N // tn,),
        in_specs=[pl.BlockSpec((tn, in_dim), lambda i: (i, 0)),
                  pl.BlockSpec((in_dim, out_p), lambda i: (0, 0)),
                  pl.BlockSpec((2, out_p), lambda i: (0, 0))],
        out_specs=(pl.BlockSpec((tn, out_p), lambda i: (i, 0)),
                   pl.BlockSpec((1, tn), lambda i: (0, i)),
                   pl.BlockSpec((tn, 1), lambda i: (i, 0))),
        compiler_params=pltpu.CompilerParams(dimension_semantics=("parallel",)),
    )(h_bf, w_p, a_p)

    # ---- stage 2: masked softmax + aggregation -----------------------------
    if z_resident:
        # Constant index map -> z DMA'd once and kept resident; sliced in-kernel.
        z_spec = pl.BlockSpec((N, out_p), lambda i, k: (0, 0))
    else:
        z_spec = pl.BlockSpec((st, out_p), lambda i, k: (k, 0))

    out_padded = pl.pallas_call(
        _make_agg_kernel(st, z_resident),
        out_shape=jax.ShapeDtypeStruct((N, out_p), jnp.float32),
        grid=(N // dt, N // st),              # reduction (src) axis last
        in_specs=[pl.BlockSpec((dt, st), lambda i, k: (i, k)),     # adj int8
                  z_spec,                                          # z bf16
                  pl.BlockSpec((1, st), lambda i, k: (0, k)),      # s_src row
                  pl.BlockSpec((dt, 1), lambda i, k: (i, 0))],     # s_dst col
        out_specs=pl.BlockSpec((dt, out_p), lambda i, k: (i, 0)),
        scratch_shapes=[pltpu.VMEM((dt, 1), jnp.float32),          # m
                        pltpu.VMEM((dt, 1), jnp.float32)],         # l
        compiler_params=pltpu.CompilerParams(
            dimension_semantics=("parallel", "arbitrary"),
            vmem_limit_bytes=_stage2_vmem_limit(N, dt, st, out_p, z_resident)),
    )(adj_i8, z, s_src, s_dst)

    return out_padded[:, :out_dim]


def xavier_normal(key, shape, gain):
    # torch xavier_normal_ on a (fan_out, fan_in) Linear weight:
    #   std = gain * sqrt(2 / (fan_in + fan_out))
    fan_out, fan_in = shape
    std = gain * (2.0 / (fan_in + fan_out)) ** 0.5
    return std * jax.random.normal(key, shape, dtype=jnp.float32)


if __name__ == "__main__":
    N, in_dim, out_dim = 64, 16, 32
    gain = 2.0 ** 0.5  # nn.init.calculate_gain('relu')

    key = jax.random.PRNGKey(0)
    k_h, k_fc, k_attn, k_adj = jax.random.split(key, 4)

    # node features
    h = jax.random.normal(k_h, (N, in_dim), dtype=jnp.float32)

    # fc weight: torch shape (out_dim, in_dim) -> pass transposed (in_dim, out_dim)
    w_fc_t = xavier_normal(k_fc, (out_dim, in_dim), gain)
    w_fc = jnp.transpose(w_fc_t)

    # attn_fc weight: torch shape (1, 2*out_dim); split into src/dst halves -> (2, out_dim)
    a_full = xavier_normal(k_attn, (1, 2 * out_dim), gain)[0]
    attn = jnp.stack([a_full[:out_dim], a_full[out_dim:]], axis=0)

    # deterministic graph: random edges + self loops so every node has an in-edge.
    # adj[i, j] = 1  means edge  j (src) -> i (dst); supplied as int8 directly.
    rand_adj = jax.random.uniform(k_adj, (N, N)) < 0.15
    adj = jnp.logical_or(rand_adj, jnp.eye(N, dtype=bool)).astype(jnp.int8)

    out = gat_layer(h, w_fc, attn, adj)
    jax.block_until_ready(out)
    assert out.shape == (N, out_dim)
    assert bool(jnp.all(jnp.isfinite(out)))
    print("KERNEL_OK")
</pallas_src>

<mosaic_0001>
module attributes {stable_mosaic.version = 11 : i64} {
  func.func @fc_kernel(%arg0: i32, %arg1: memref<64x16xbf16, #tpu.memory_space<vmem>>, %arg2: memref<16x128xbf16, #tpu.memory_space<vmem>>, %arg3: memref<2x128xf32, #tpu.memory_space<vmem>>, %arg4: memref<64x128xbf16, #tpu.memory_space<vmem>>, %arg5: memref<1x64xf32, #tpu.memory_space<vmem>>, %arg6: memref<64x1xf32, #tpu.memory_space<vmem>>) attributes {dimension_semantics = [#tpu.dimension_semantics<parallel>], iteration_bounds = array<i64: 1>, scalar_prefetch = 0 : i64, scratch_operands = 0 : i64, tpu.core_type = #tpu.core_type<tc>, window_params = [{transform_indices = @transform_0, window_bounds = array<i64: 64, 16>}, {pipeline_mode = #tpu.pipeline_mode<synchronous>, transform_indices = @transform_1, window_bounds = array<i64: 16, 128>}, {pipeline_mode = #tpu.pipeline_mode<synchronous>, transform_indices = @transform_2, window_bounds = array<i64: 2, 128>}, {transform_indices = @transform_3, window_bounds = array<i64: 64, 128>}, {transform_indices = @transform_4, window_bounds = array<i64: 1, 64>}, {transform_indices = @transform_5, window_bounds = array<i64: 64, 1>}]} {
    %c0 = arith.constant 0 : index
    %c0_0 = arith.constant 0 : index
    %0 = vector.load %arg1[%c0, %c0_0] : memref<64x16xbf16, #tpu.memory_space<vmem>>, vector<64x16xbf16>
    %c0_1 = arith.constant 0 : index
    %c0_2 = arith.constant 0 : index
    %1 = vector.load %arg2[%c0_1, %c0_2] : memref<16x128xbf16, #tpu.memory_space<vmem>>, vector<16x128xbf16>
    %cst = arith.constant dense<0.000000e+00> : vector<64x128xf32>
    %2 = tpu.matmul %0, %1, %cst {dimension_numbers = #tpu.dot_dimension_numbers<[1], [0], [0], [1], [0, 0, 1, 1], [], []>} : vector<64x16xbf16>, vector<16x128xbf16>, vector<64x128xf32> -> vector<64x128xf32>
    %c0_3 = arith.constant 0 : index
    %c0_4 = arith.constant 0 : index
    %3 = vector.load %arg3[%c0_3, %c0_4] : memref<2x128xf32, #tpu.memory_space<vmem>>, vector<2x128xf32>
    %4 = vector.extract_strided_slice %3 {offsets = [1, 0], sizes = [1, 128], strides = [1, 1]} : vector<2x128xf32> to vector<1x128xf32>
    %5 = vector.broadcast %4 : vector<1x128xf32> to vector<64x128xf32>
    %6 = arith.mulf %2, %5 : vector<64x128xf32>
    %cst_5 = arith.constant dense<0.000000e+00> : vector<64xf32>
    %7 = vector.multi_reduction <add>, %6, %cst_5 [1] : vector<64x128xf32> to vector<64xf32>
    %8 = vector.shape_cast %7 : vector<64xf32> to vector<64x1xf32>
    %c0_6 = arith.constant 0 : index
    %c0_7 = arith.constant 0 : index
    %9 = vector.load %arg6[%c0_6, %c0_7] : memref<64x1xf32, #tpu.memory_space<vmem>>, vector<64x1xf32>
    tpu.vector_store %arg6[%c0_6, %c0_7], %8 {strides = array<i32>} : memref<64x1xf32, #tpu.memory_space<vmem>>, vector<64x1xf32>,
    %10 = vector.extract_strided_slice %3 {offsets = [0, 0], sizes = [1, 128], strides = [1, 1]} : vector<2x128xf32> to vector<1x128xf32>
    %cst_8 = arith.constant dense<0.000000e+00> : vector<1x64xf32>
    %11 = tpu.matmul %10, %2, %cst_8 {dimension_numbers = #tpu.dot_dimension_numbers<[1], [1], [0], [0], [0, 0, 1, 0], [], []>} : vector<1x128xf32>, vector<64x128xf32>, vector<1x64xf32> -> vector<1x64xf32>
    %c0_9 = arith.constant 0 : index
    %c0_10 = arith.constant 0 : index
    %12 = vector.load %arg5[%c0_9, %c0_10] : memref<1x64xf32, #tpu.memory_space<vmem>>, vector<1x64xf32>
    tpu.vector_store %arg5[%c0_9, %c0_10], %11 {strides = array<i32>} : memref<1x64xf32, #tpu.memory_space<vmem>>, vector<1x64xf32>,
    %13 = arith.truncf %2 : vector<64x128xf32> to vector<64x128xbf16>
    %c0_11 = arith.constant 0 : index
    %c0_12 = arith.constant 0 : index
    %14 = vector.load %arg4[%c0_11, %c0_12] : memref<64x128xbf16, #tpu.memory_space<vmem>>, vector<64x128xbf16>
    tpu.vector_store %arg4[%c0_11, %c0_12], %13 {strides = array<i32>} : memref<64x128xbf16, #tpu.memory_space<vmem>>, vector<64x128xbf16>,
    return
  }
  func.func @transform_0(%arg0: i32) -> (i32, i32) {
    %c0_i32 = arith.constant 0 : i32
    %c0_i32_0 = arith.constant 0 : i32
    return %arg0, %c0_i32 : i32, i32
  }
  func.func @transform_1(%arg0: i32) -> (i32, i32) {
    %c0_i32 = arith.constant 0 : i32
    %c0_i32_0 = arith.constant 0 : i32
    %c0_i32_1 = arith.constant 0 : i32
    return %c0_i32, %c0_i32_0 : i32, i32
  }
  func.func @transform_2(%arg0: i32) -> (i32, i32) {
    %c0_i32 = arith.constant 0 : i32
    %c0_i32_0 = arith.constant 0 : i32
    %c0_i32_1 = arith.constant 0 : i32
    return %c0_i32, %c0_i32_0 : i32, i32
  }
  func.func @transform_3(%arg0: i32) -> (i32, i32) {
    %c0_i32 = arith.constant 0 : i32
    %c0_i32_0 = arith.constant 0 : i32
    return %arg0, %c0_i32 : i32, i32
  }
  func.func @transform_4(%arg0: i32) -> (i32, i32) {
    %c0_i32 = arith.constant 0 : i32
    %c0_i32_0 = arith.constant 0 : i32
    return %c0_i32, %arg0 : i32, i32
  }
  func.func @transform_5(%arg0: i32) -> (i32, i32) {
    %c0_i32 = arith.constant 0 : i32
    %c0_i32_0 = arith.constant 0 : i32
    return %arg0, %c0_i32 : i32, i32
  }
}

</mosaic_0001>

<bundles_post_ra>
// kernel: tpu_custom_call.1
= control target key start
LH: loop header
LB: loop body
LE: loop exit
PB: predicated region body
PF: predicated region fallthrough
CT: control target
= control target key end

     0   :  { %11 = vsyncpa [#allocation3], 0  ;;  %s408_s0 = inlined_call_operand.vmem [shape: bf16[64,16], index: 0, kind: input, shape index: {}]   ;;  %s409_s1 = inlined_call_operand.vmem [shape: bf16[16,128], index: 1, kind: input, shape index: {}]   ;;  %s410_s2 = inlined_call_operand.vmem [shape: f32[2,128], index: 2, kind: input, shape index: {}]   ;;  %s411_s3 = inlined_call_operand.hbm [shape: bf16[64,128], index: 3, kind: output, shape index: {0}]   ;;  %s412_s4 = inlined_call_operand.hbm [shape: f32[1,64], index: 4, kind: output, shape index: {1}]   ;;  %s413_s5 = inlined_call_operand.vmem [shape: f32[64,1], index: 5, kind: output, shape index: {2}]  }
   0x1   :  { %v237_v0 = vld [vmem:[%s409_s1] sm:$0xff]  ;;  %v235_v2 = vld [vmem:[%s408_s0 + $0x10] sm:$0xff] }
   0x2   :  { %v233_v1 = vld [vmem:[%s408_s0] sm:$0xff] }
   0x3   :  { %12 = vsyncpa [#allocation5], 0  ;;  %76 = vmatpush.bf16.msra.mxu0 %v237_v0  ;;  %261 = vmatpush.bf16.msra.mxu2 %v237_v0  ;;  %vm56_vm0 = vcmask 130048   ;;  %v234_v3 = vld [vmem:[%s408_s0 + $0x8] sm:$0xff]  ;;  %v236_v4 = vld [vmem:[%s408_s0 + $0x18] sm:$0xff]  ;;  %s318_s0 = smov [#allocation2]  }
   0x4   :  { %v98_v5 = vld [vmem:[%s410_s2] sm:$0x3]  ;;  %s175_s2 = sshll.u32 %s318_s0, 4  ;;  %s177_s6 = sshll.u32 %s411_s3, 4  ;;  %vm124_vm1 = vcmask 7168   ;;  %vm153_vm2 = vcmask 516096   ;;  %s176_s2 = int_to_ptr.vmem [resolvable:$true] %s175_s2  ;;  %s178_s6 = int_to_ptr.hbm [resolvable:$true] %s177_s6 }
   0x5   :  { %v99_v6 = vperm.slane %v98_v5, 1  ;;  %s319_s7 = smov 64   ;;  %s320_s8 = smov 4  }
   0x6   :  { %229 = vmatmul.msk.bf16.vlgmr.msra.gmra.mxu0 %vm56_vm0, %v233_v1  ;;  %231 = vmatmul.msk.bf16.vlgmr.msra.gmra.mxu2 %vm56_vm0, %v235_v2  ;;  %s321_s24 = smov [#allocation4]   ;;  %s191_s27 = sshll.u32 %s412_s4, 4  ;;  %s192_s27 = int_to_ptr.hbm [resolvable:$true] %s191_s27 }
   0x7   :  { %s189_s25 = sshll.u32 %s321_s24, 4  ;;  %s190_s25 = int_to_ptr.vmem [resolvable:$true] %s189_s25 }
  0x16   :  { %230 = vmatmul.msk.bf16.gmra.mxu0 %vm56_vm0, %v234_v3  ;;  %232 = vmatmul.msk.bf16.gmra.mxu2 %vm56_vm0, %v236_v4 }
  0x83   :  { %v78_v7 = vpop.f32.mrf.mxu0 }
  0x84   :  { %v100_v8 = vmul.f32 %v99_v6, %v78_v7 }
  0x86   :  { %108 = vadd.xlane.f32.xlu0 %v100_v8 }
  0x89   :  { %v88_v9 = vpop.f32.mrf.mxu2 }
  0x8a   :  { %v104_v10 = vmul.f32 %v99_v6, %v88_v9 }
  0x8b   :  { %v80_v11 = vpop.f32.mrf.mxu0 }
  0x8c   :  { %v241_v12 = vpack.c.bf16 %v80_v11, %v78_v7  ;;  %116 = vadd.xlane.f32.xlu2 %v104_v10  ;;  %v101_v13 = vmul.f32 %v99_v6, %v80_v11 }
  0x8e   :  { %242 = vst [vmem:[#allocation2] sm:$0xff] %v241_v12   ;;  %110 = vadd.xlane.f32.xlu0 %v101_v13 }
  0x91   :  { %v90_v14 = vpop.f32.mrf.mxu2 }
  0x92   :  { %v251_v15 = vpack.c.bf16 %v90_v14, %v88_v9  ;;  %v105_v16 = vmul.f32 %v99_v6, %v90_v14 }
  0x93   :  { %v83_v17 = vpop.f32.mrf.mxu0 }
  0x94   :  { %259 = vst [vmem:[#allocation2 + $0x10] sm:$0xff] %v251_v15   ;;  %118 = vadd.xlane.f32.xlu2 %v105_v16  ;;  %v102_v18 = vmul.f32 %v99_v6, %v83_v17 }
  0x96   :  { %112 = vadd.xlane.f32.xlu1 %v102_v18 }
  0x99   :  { %v93_v19 = vpop.f32.mrf.mxu2 }
  0x9a   :  { %v106_v20 = vmul.f32 %v99_v6, %v93_v19 }
  0x9b   :  { %v85_v21 = vpop.f32.mrf.mxu0 }
  0x9c   :  { %v246_v22 = vpack.c.bf16 %v85_v21, %v83_v17  ;;  %120 = vadd.xlane.f32.xlu0 %v106_v20  ;;  %v103_v23 = vmul.f32 %v99_v6, %v85_v21 }
  0x9e   :  { %258 = vst [vmem:[#allocation2 + $0x8] sm:$0xff] %v246_v22   ;;  %114 = vadd.xlane.f32.xlu1 %v103_v23 }
  0xa1   :  { %v95_v24 = vpop.f32.mrf.mxu2 }
  0xa2   :  { %v256_v25 = vpack.c.bf16 %v95_v24, %v93_v19  ;;  %141 = vmatpush.xpose.msra.mxu1 %v95_v24  ;;  %v107_v26 = vmul.f32 %v99_v6, %v95_v24 }
  0xa4   :  { %260 = vst [vmem:[#allocation2 + $0x18] sm:$0xff] %v256_v25  }
  0xa5   :  { %183 = dma.vmem_to_hbm [thread:$0]  %s176_s2, 512, %s178_s6, [#allocation3], %s319_s7, %s319_s7, %s320_s8  }
  0xa6   :  { %142 = vmatpush.xpose.msra.mxu1 %v93_v19  ;;  %122 = vadd.xlane.f32.xlu1 %v107_v26 }
  0xaa   :  { %143 = vmatpush.xpose.msra.mxu1 %v90_v14 }
  0xae   :  { %144 = vmatpush.xpose.msra.mxu1 %v88_v9 }
  0xb2   :  { %145 = vmatpush.xpose.msra.mxu1 %v85_v21 }
  0xb6   :  { %146 = vmatpush.xpose.msra.mxu1 %v83_v17 }
  0xba   :  { %147 = vmatpush.xpose.msra.mxu1 %v80_v11 }
  0xbe   :  { %148 = vmatpush.xpose.msra.mxu1 %v78_v7 }
  0xc1   :  { %149 = vmatmul.f32.vlgmr.msra.gmra.mxu1 %v98_v5 }
  0xf9   :  { %v109_v27 = vpop.xlane.xlu0 %108 }
  0xfa   :  { %125 = vst.msk [vmem:[%s413_s5] sm:$0xff] %vm124_vm1, %v109_v27 }
  0xff   :  { %v117_v28 = vpop.xlane.xlu2 %116 }
 0x100   :  { %129 = vst.msk [vmem:[%s413_s5 + $0x20] sm:$0xff] %vm124_vm1, %v117_v28 }
 0x101   :  { %v111_v29 = vpop.xlane.xlu0 %110 }
 0x102   :  { %126 = vst.msk [vmem:[%s413_s5 + $0x8] sm:$0xff] %vm124_vm1, %v111_v29 }
 0x107   :  { %v119_v30 = vpop.xlane.xlu2 %118 }
 0x108   :  { %130 = vst.msk [vmem:[%s413_s5 + $0x28] sm:$0xff] %vm124_vm1, %v119_v30 }
 0x109   :  { %v113_v31 = vpop.xlane.xlu1 %112 }
 0x10a   :  { %127 = vst.msk [vmem:[%s413_s5 + $0x10] sm:$0xff] %vm124_vm1, %v113_v31 }
 0x10f   :  { %v121_v32 = vpop.xlane.xlu0 %120 }
 0x110   :  { %131 = vst.msk [vmem:[%s413_s5 + $0x30] sm:$0xff] %vm124_vm1, %v121_v32 }
 0x111   :  { %v115_v33 = vpop.xlane.xlu1 %114 }
 0x112   :  { %128 = vst.msk [vmem:[%s413_s5 + $0x18] sm:$0xff] %vm124_vm1, %v115_v33 }
 0x119   :  { %v123_v34 = vpop.xlane.xlu1 %122 }
 0x11a   :  { %132 = vst.msk [vmem:[%s413_s5 + $0x38] sm:$0xff] %vm124_vm1, %v123_v34 }
 0x13e   :  { %v150_v35 = vpop.f32.mrf.mxu1 }
 0x13f   :  { %154 = vst.msk [vmem:[#allocation4] sm:$0x1] %vm153_vm2, %v150_v35 }
 0x140   :  { %194 = dma.vmem_to_hbm [thread:$0]  %s190_s25, 16, %s192_s27, [#allocation5]  }
 0x141   :  { %314 = dma.done.wait [#allocation3], 512  }
 0x142   :  { %315 = vsyncadd [#allocation3], 4294966784 }
 0x143   :  { %316 = dma.done.wait [#allocation5], 16  }
 0x144   :  { %317 = vsyncadd [#allocation5], 4294967280 }
 0x145   :  { %207 = vsyncpa [#allocation3], 1 }
 0x146   :  { %208 = vsyncpa [#allocation5], 1 }

</bundles_post_ra>
